<compile_context>
chip_gen: v6e
topology: v6e:2x2x1
jax: 0.10.0
libtpu: 0.0.40
codegen_flags: <defaults>
</compile_context>

<pallas_src>
import functools
import math

import numpy as np
import jax
import jax.numpy as jnp
from jax.experimental import pallas as pl
from jax.experimental.pallas import tpu as pltpu


def _round_up(x, m):
    return ((x + m - 1) // m) * m


def _pick_tile(dim_pad, granule, max_tile):
    """Pick a tile size (multiple of `granule`, <= max_tile, <= dim_pad) that
    minimises the padded extent round_up(dim_pad, tile); ties go to the larger
    tile (fewer grid steps)."""
    max_tile = max(granule, min(max_tile, dim_pad))
    best_t, best_pad = granule, _round_up(dim_pad, granule)
    t = granule
    while t <= max_tile:
        padded = _round_up(dim_pad, t)
        if padded < best_pad or (padded == best_pad and t > best_t):
            best_pad, best_t = padded, t
        t += granule
    return best_t


def _cost_kernel(probs_ref, points_ref, onehot_t_ref, tgt_pts_t_ref, cost_ref,
                 *, nc, const_label, point_sign):
    # probs_ref    : [TM, C]  == -cost_class * softmax(logits)   (folded in wrapper)
    # points_ref   : [TM, 2]  pre-scaled by |cost_point|
    # onehot_t_ref : [C, TN]  one-hot target classes, transposed
    # tgt_pts_t_ref: [2, TN]  target points, transposed, pre-scaled by |cost_point|
    # cost_ref     : [TM, TN]
    x = points_ref[...]                              # [TM, 2]
    y = tgt_pts_t_ref[...]                           # [2, TN]
    dx = x[:, 0:1] - y[0:1, :]                       # [TM, TN]
    dy = x[:, 1:2] - y[1:2, :]                       # [TM, TN]
    pt = jnp.sqrt(dx * dx + dy * dy)                 # |cost_point| * L2 distance
    if point_sign < 0:                               # static; usually a no-op
        pt = -pt

    probs = probs_ref[...]                           # [TM, C]
    if const_label is not None:
        # All targets share a single class: class cost is a per-row scalar.
        cost_ref[...] = pt + probs[:, const_label:const_label + 1]
    elif nc < 64:
        # Tiny class count: unrolled broadcast FMAs on the VPU (skip the MXU).
        onehot = onehot_t_ref[...]                   # [C, TN]
        acc = pt + probs[:, 0:1] * onehot[0:1, :]
        for c in range(1, nc):
            acc = acc + probs[:, c:c + 1] * onehot[c:c + 1, :]
        cost_ref[...] = acc
    else:
        cost_ref[...] = pt + jnp.dot(probs, onehot_t_ref[...],
                                     preferred_element_type=jnp.float32)


def compute_block_cost(pred_logits, pred_points, onehot_t, tgt_pts_t,
                       cost_class=1.0, cost_point=1.0, const_label=None):
    """Per-image cost blocks.

    pred_logits : [bs, nq, C]
    pred_points : [bs, nq, 2]
    onehot_t    : [bs, C, Tmax_pad]   (Tmax_pad a multiple of 128)
    tgt_pts_t   : [bs, 2, Tmax_pad]
    Returns [bs, nq_row_pad, Tmax_col_pad] float32; the caller slices
    [b, :nq, :sizes[b]].
    """
    bs, nq, nc = pred_logits.shape
    t_pad = int(onehot_t.shape[-1])

    # Fold -cost_class into the softmax output (tiny [bs,nq,C], XLA-fused).
    probs = (-float(cost_class)) * jax.nn.softmax(
        pred_logits.astype(jnp.float32), axis=-1)
    # Fold |cost_point| into both point operands; the (rare) negative sign is
    # applied to the distance inside the kernel at zero extra full-tile cost.
    pscale = abs(float(cost_point))
    point_sign = 1 if float(cost_point) >= 0.0 else -1
    points = pscale * pred_points.astype(jnp.float32)
    tgt_pts_t = pscale * tgt_pts_t.astype(jnp.float32)
    onehot_t = onehot_t.astype(jnp.float32)

    nq_pad = _round_up(nq, 8)
    if nq_pad != nq:
        probs = jnp.pad(probs, ((0, 0), (0, nq_pad - nq), (0, 0)))
        points = jnp.pad(points, ((0, 0), (0, nq_pad - nq), (0, 0)))

    # Tile selection: lane-dense columns; <=4 MiB f32 output tile so double
    # buffering fits the scoped VMEM default on v5e/v6e/v7x.
    MAX_TILE_ELEMS = 1 << 20                                   # 4 MiB of f32
    TN = _pick_tile(t_pad, 128, 2048)
    TM = _pick_tile(nq_pad, 8, max(8, ((MAX_TILE_ELEMS // TN) // 8) * 8))

    # Keep >=2 grid blocks so both v7x TensorCores get work.
    n_blocks = bs * pl.cdiv(nq_pad, TM) * pl.cdiv(t_pad, TN)
    if n_blocks < 2:
        if TM >= 16:
            TM = max(8, ((TM // 2) // 8) * 8)
        elif TN >= 256:
            TN = max(128, ((TN // 2) // 128) * 128)

    row_pad = _round_up(nq_pad, TM)
    col_pad = _round_up(t_pad, TN)
    if row_pad != nq_pad:
        probs = jnp.pad(probs, ((0, 0), (0, row_pad - nq_pad), (0, 0)))
        points = jnp.pad(points, ((0, 0), (0, row_pad - nq_pad), (0, 0)))
    if col_pad != t_pad:
        onehot_t = jnp.pad(onehot_t, ((0, 0), (0, 0), (0, col_pad - t_pad)))
        tgt_pts_t = jnp.pad(tgt_pts_t, ((0, 0), (0, 0), (0, col_pad - t_pad)))

    kernel = functools.partial(_cost_kernel, nc=nc, const_label=const_label,
                               point_sign=point_sign)

    cost = pl.pallas_call(
        kernel,
        out_shape=jax.ShapeDtypeStruct((bs, row_pad, col_pad), jnp.float32),
        grid=(bs, row_pad // TM, col_pad // TN),
        in_specs=[
            pl.BlockSpec((None, TM, nc), lambda b, i, j: (b, i, 0)),
            pl.BlockSpec((None, TM, 2), lambda b, i, j: (b, i, 0)),
            pl.BlockSpec((None, nc, TN), lambda b, i, j: (b, 0, j)),
            pl.BlockSpec((None, 2, TN), lambda b, i, j: (b, 0, j)),
        ],
        out_specs=pl.BlockSpec((None, TM, TN), lambda b, i, j: (b, i, j)),
        compiler_params=pltpu.CompilerParams(
            dimension_semantics=("parallel", "parallel", "parallel")),
    )(probs, points, onehot_t, tgt_pts_t)
    return cost


def _build_target_tensors(targets, nc):
    """Per-image padded target tensors (block-diagonal layout)."""
    bs = len(targets)
    sizes = [int(np.asarray(t["point"]).shape[0]) for t in targets]
    t_max = max(sizes) if sizes else 0
    t_pad = _round_up(max(t_max, 1), 128)

    onehot_t = np.zeros((bs, nc, t_pad), dtype=np.float32)
    tgt_pts_t = np.zeros((bs, 2, t_pad), dtype=np.float32)
    all_labels = []
    for b, t in enumerate(targets):
        nb = sizes[b]
        if nb == 0:
            continue
        lbl = np.asarray(t["labels"]).astype(np.int64).reshape(-1)
        pts = np.asarray(t["point"]).astype(np.float32).reshape(nb, 2)
        onehot_t[b, lbl, np.arange(nb)] = 1.0
        tgt_pts_t[b, :, :nb] = pts.T
        all_labels.append(lbl)

    const_label = None
    if all_labels:
        uniq = np.unique(np.concatenate(all_labels))
        if uniq.size == 1:
            const_label = int(uniq[0])
    return sizes, onehot_t, tgt_pts_t, const_label


def _linear_sum_assignment(c):
    """Host-side optimal assignment on a small rectangular cost matrix."""
    # TODO(synk): linear_sum_assignment is a sequential, data-dependent combinatorial
    # algorithm; it runs on the host, not inside the Pallas kernel.
    try:
        from scipy.optimize import linear_sum_assignment
        return linear_sum_assignment(c)
    except ImportError:
        import itertools
        nq, nt = c.shape
        if nt > nq:
            j, i = _linear_sum_assignment(c.T)
            order = np.argsort(i)
            return np.asarray(i)[order], np.asarray(j)[order]
        if math.perm(nq, nt) > 500_000:
            raise RuntimeError(
                "scipy is required for linear_sum_assignment at this problem size")
        best_rows, best_cost = None, None
        for rows in itertools.permutations(range(nq), nt):
            cost = sum(c[r, k] for k, r in enumerate(rows))
            if best_cost is None or cost < best_cost:
                best_cost, best_rows = cost, rows
        i = np.asarray(best_rows)
        j = np.arange(nt)
        order = np.argsort(i)
        return i[order], j[order]


def hungarian_matcher_crowd_val(outputs, targets, cost_class=1.0, cost_point=1.0):
    """JAX/Pallas equivalent of HungarianMatcher_Crowd_Val.forward."""
    pred_logits = outputs["pred_logits"]
    pred_points = outputs["pred_points"]
    bs, nq, nc = pred_logits.shape

    sizes, onehot_t, tgt_pts_t, const_label = _build_target_tensors(targets, nc)
    if sum(sizes) == 0:
        empty = np.zeros((0,), dtype=np.int64)
        return [(empty, empty) for _ in targets]

    C = compute_block_cost(pred_logits, pred_points,
                           jnp.asarray(onehot_t), jnp.asarray(tgt_pts_t),
                           cost_class=cost_class, cost_point=cost_point,
                           const_label=const_label)
    C = np.asarray(jax.block_until_ready(C))        # [bs, nq_pad, Tmax_pad]

    indices = []
    for b in range(bs):
        if sizes[b] == 0:
            empty = np.zeros((0,), dtype=np.int64)
            indices.append((empty, empty))
            continue
        i, j = _linear_sum_assignment(C[b, :nq, :sizes[b]])
        indices.append((np.asarray(i, dtype=np.int64),
                        np.asarray(j, dtype=np.int64)))
    return indices


def _reference_block(pred_logits, pred_points, labels, points, b, nq,
                     cost_class=1.0, cost_point=1.0):
    """Pure-numpy reference for one image's [nq, nt] cost block."""
    probs = np.asarray(jax.nn.softmax(pred_logits[b].astype(jnp.float32), axis=-1))
    cls = -probs[:, np.asarray(labels)]
    d = np.asarray(pred_points[b], dtype=np.float32)[:, None, :] - \
        np.asarray(points, dtype=np.float32)[None, :, :]
    dist = np.sqrt((d * d).sum(-1))
    return cost_point * dist + cost_class * cls


if __name__ == "__main__":
    key = jax.random.PRNGKey(0)
    bs, nq, nc = 2, 8, 4
    sizes = [3, 5]

    k1, k2, k3, k4 = jax.random.split(key, 4)
    pred_logits = jax.random.normal(k1, (bs, nq, nc), dtype=jnp.float32)
    pred_points = jax.random.uniform(k2, (bs, nq, 2), dtype=jnp.float32)

    label_keys = jax.random.split(k3, bs)
    point_keys = jax.random.split(k4, bs)
    targets = [
        {
            "labels": jax.random.randint(label_keys[b], (sizes[b],), 0, nc,
                                         dtype=jnp.int32),
            "point": jax.random.uniform(point_keys[b], (sizes[b], 2),
                                        dtype=jnp.float32),
        }
        for b in range(bs)
    ]
    outputs = {"pred_logits": pred_logits, "pred_points": pred_points}

    # --- full matcher path (general labels) ---
    indices = hungarian_matcher_crowd_val(outputs, targets)
    for b, (i, j) in enumerate(indices):
        assert len(i) == len(j) == min(nq, sizes[b])

    # --- validate the Pallas per-image cost blocks against a numpy reference ---
    szs, oh_t, tp_t, const_label = _build_target_tensors(targets, nc)
    C = compute_block_cost(pred_logits, pred_points, jnp.asarray(oh_t),
                           jnp.asarray(tp_t), 1.0, 1.0, const_label)
    C = np.asarray(jax.block_until_ready(C))
    for b in range(bs):
        ref = _reference_block(pred_logits, pred_points,
                               targets[b]["labels"], targets[b]["point"], b, nq)
        assert np.allclose(C[b, :nq, :szs[b]], ref, atol=1e-5, rtol=1e-5), \
            "cost block mismatch (general labels)"

    # --- constant-label fast path (typical crowd-counting case) ---
    targets_const = [
        {"labels": jnp.ones((sizes[b],), dtype=jnp.int32), "point": targets[b]["point"]}
        for b in range(bs)
    ]
    szs_c, oh_c, tp_c, const_label_c = _build_target_tensors(targets_const, nc)
    assert const_label_c == 1
    Cc = compute_block_cost(pred_logits, pred_points, jnp.asarray(oh_c),
                            jnp.asarray(tp_c), 1.0, 1.0, const_label_c)
    Cc = np.asarray(jax.block_until_ready(Cc))
    for b in range(bs):
        ref = _reference_block(pred_logits, pred_points,
                               targets_const[b]["labels"],
                               targets_const[b]["point"], b, nq)
        assert np.allclose(Cc[b, :nq, :szs_c[b]], ref, atol=1e-5, rtol=1e-5), \
            "cost block mismatch (constant-label fast path)"

    indices_const = hungarian_matcher_crowd_val(outputs, targets_const)
    for b, (i, j) in enumerate(indices_const):
        assert len(i) == len(j) == min(nq, sizes[b])

    print("KERNEL_OK")
</pallas_src>

<mosaic_0001>
module attributes {stable_mosaic.version = 11 : i64} {
  func.func @_cost_kernel(%arg0: i32, %arg1: i32, %arg2: i32, %arg3: memref<1x8x4xf32, #tpu.memory_space<vmem>>, %arg4: memref<1x8x2xf32, #tpu.memory_space<vmem>>, %arg5: memref<1x4x128xf32, #tpu.memory_space<vmem>>, %arg6: memref<1x2x128xf32, #tpu.memory_space<vmem>>, %arg7: memref<1x8x128xf32, #tpu.memory_space<vmem>>) attributes {dimension_semantics = [#tpu.dimension_semantics<parallel>, #tpu.dimension_semantics<parallel>, #tpu.dimension_semantics<parallel>], iteration_bounds = array<i64: 2, 1, 1>, scalar_prefetch = 0 : i64, scratch_operands = 0 : i64, tpu.core_type = #tpu.core_type<tc>, window_params = [{transform_indices = @transform_0, window_bounds = array<i64: 1, 8, 4>}, {transform_indices = @transform_1, window_bounds = array<i64: 1, 8, 2>}, {transform_indices = @transform_2, window_bounds = array<i64: 1, 4, 128>}, {transform_indices = @transform_3, window_bounds = array<i64: 1, 2, 128>}, {transform_indices = @transform_4, window_bounds = array<i64: 1, 8, 128>}]} {
    %c0 = arith.constant 0 : index
    %c0_0 = arith.constant 0 : index
    %c0_1 = arith.constant 0 : index
    %0 = vector.load %arg4[%c0, %c0_0, %c0_1] : memref<1x8x2xf32, #tpu.memory_space<vmem>>, vector<1x8x2xf32>
    %1 = vector.shape_cast %0 : vector<1x8x2xf32> to vector<8x2xf32>
    %c0_2 = arith.constant 0 : index
    %c0_3 = arith.constant 0 : index
    %c0_4 = arith.constant 0 : index
    %2 = vector.load %arg6[%c0_2, %c0_3, %c0_4] : memref<1x2x128xf32, #tpu.memory_space<vmem>>, vector<1x2x128xf32>
    %3 = vector.shape_cast %2 : vector<1x2x128xf32> to vector<2x128xf32>
    %4 = vector.extract_strided_slice %1 {offsets = [0, 0], sizes = [8, 1], strides = [1, 1]} : vector<8x2xf32> to vector<8x1xf32>
    %5 = vector.extract_strided_slice %3 {offsets = [0, 0], sizes = [1, 128], strides = [1, 1]} : vector<2x128xf32> to vector<1x128xf32>
    %6 = vector.broadcast %4 : vector<8x1xf32> to vector<8x128xf32>
    %7 = vector.broadcast %5 : vector<1x128xf32> to vector<8x128xf32>
    %8 = arith.subf %6, %7 : vector<8x128xf32>
    %9 = vector.extract_strided_slice %1 {offsets = [0, 1], sizes = [8, 1], strides = [1, 1]} : vector<8x2xf32> to vector<8x1xf32>
    %10 = vector.extract_strided_slice %3 {offsets = [1, 0], sizes = [1, 128], strides = [1, 1]} : vector<2x128xf32> to vector<1x128xf32>
    %11 = vector.broadcast %9 : vector<8x1xf32> to vector<8x128xf32>
    %12 = vector.broadcast %10 : vector<1x128xf32> to vector<8x128xf32>
    %13 = arith.subf %11, %12 : vector<8x128xf32>
    %14 = arith.mulf %8, %8 : vector<8x128xf32>
    %15 = arith.mulf %13, %13 : vector<8x128xf32>
    %16 = arith.addf %14, %15 : vector<8x128xf32>
    %17 = math.sqrt %16 : vector<8x128xf32>
    %c0_5 = arith.constant 0 : index
    %c0_6 = arith.constant 0 : index
    %c0_7 = arith.constant 0 : index
    %18 = vector.load %arg3[%c0_5, %c0_6, %c0_7] : memref<1x8x4xf32, #tpu.memory_space<vmem>>, vector<1x8x4xf32>
    %19 = vector.shape_cast %18 : vector<1x8x4xf32> to vector<8x4xf32>
    %c0_8 = arith.constant 0 : index
    %c0_9 = arith.constant 0 : index
    %c0_10 = arith.constant 0 : index
    %20 = vector.load %arg5[%c0_8, %c0_9, %c0_10] : memref<1x4x128xf32, #tpu.memory_space<vmem>>, vector<1x4x128xf32>
    %21 = vector.shape_cast %20 : vector<1x4x128xf32> to vector<4x128xf32>
    %22 = vector.extract_strided_slice %19 {offsets = [0, 0], sizes = [8, 1], strides = [1, 1]} : vector<8x4xf32> to vector<8x1xf32>
    %23 = vector.extract_strided_slice %21 {offsets = [0, 0], sizes = [1, 128], strides = [1, 1]} : vector<4x128xf32> to vector<1x128xf32>
    %24 = vector.broadcast %22 : vector<8x1xf32> to vector<8x128xf32>
    %25 = vector.broadcast %23 : vector<1x128xf32> to vector<8x128xf32>
    %26 = arith.mulf %24, %25 : vector<8x128xf32>
    %27 = arith.addf %17, %26 : vector<8x128xf32>
    %28 = vector.extract_strided_slice %19 {offsets = [0, 1], sizes = [8, 1], strides = [1, 1]} : vector<8x4xf32> to vector<8x1xf32>
    %29 = vector.extract_strided_slice %21 {offsets = [1, 0], sizes = [1, 128], strides = [1, 1]} : vector<4x128xf32> to vector<1x128xf32>
    %30 = vector.broadcast %28 : vector<8x1xf32> to vector<8x128xf32>
    %31 = vector.broadcast %29 : vector<1x128xf32> to vector<8x128xf32>
    %32 = arith.mulf %30, %31 : vector<8x128xf32>
    %33 = arith.addf %27, %32 : vector<8x128xf32>
    %34 = vector.extract_strided_slice %19 {offsets = [0, 2], sizes = [8, 1], strides = [1, 1]} : vector<8x4xf32> to vector<8x1xf32>
    %35 = vector.extract_strided_slice %21 {offsets = [2, 0], sizes = [1, 128], strides = [1, 1]} : vector<4x128xf32> to vector<1x128xf32>
    %36 = vector.broadcast %34 : vector<8x1xf32> to vector<8x128xf32>
    %37 = vector.broadcast %35 : vector<1x128xf32> to vector<8x128xf32>
    %38 = arith.mulf %36, %37 : vector<8x128xf32>
    %39 = arith.addf %33, %38 : vector<8x128xf32>
    %40 = vector.extract_strided_slice %19 {offsets = [0, 3], sizes = [8, 1], strides = [1, 1]} : vector<8x4xf32> to vector<8x1xf32>
    %41 = vector.extract_strided_slice %21 {offsets = [3, 0], sizes = [1, 128], strides = [1, 1]} : vector<4x128xf32> to vector<1x128xf32>
    %42 = vector.broadcast %40 : vector<8x1xf32> to vector<8x128xf32>
    %43 = vector.broadcast %41 : vector<1x128xf32> to vector<8x128xf32>
    %44 = arith.mulf %42, %43 : vector<8x128xf32>
    %45 = arith.addf %39, %44 : vector<8x128xf32>
    %c0_11 = arith.constant 0 : index
    %c0_12 = arith.constant 0 : index
    %c0_13 = arith.constant 0 : index
    %46 = vector.load %arg7[%c0_11, %c0_12, %c0_13] : memref<1x8x128xf32, #tpu.memory_space<vmem>>, vector<1x8x128xf32>
    %47 = vector.shape_cast %46 : vector<1x8x128xf32> to vector<8x128xf32>
    %48 = vector.shape_cast %45 : vector<8x128xf32> to vector<1x8x128xf32>
    tpu.vector_store %arg7[%c0_11, %c0_12, %c0_13], %48 {strides = array<i32>} : memref<1x8x128xf32, #tpu.memory_space<vmem>>, vector<1x8x128xf32>,
    return
  }
  func.func @transform_0(%arg0: i32, %arg1: i32, %arg2: i32) -> (i32, i32, i32) {
    %c0_i32 = arith.constant 0 : i32
    %c0_i32_0 = arith.constant 0 : i32
    return %arg0, %arg1, %c0_i32 : i32, i32, i32
  }
  func.func @transform_1(%arg0: i32, %arg1: i32, %arg2: i32) -> (i32, i32, i32) {
    %c0_i32 = arith.constant 0 : i32
    %c0_i32_0 = arith.constant 0 : i32
    return %arg0, %arg1, %c0_i32 : i32, i32, i32
  }
  func.func @transform_2(%arg0: i32, %arg1: i32, %arg2: i32) -> (i32, i32, i32) {
    %c0_i32 = arith.constant 0 : i32
    %c0_i32_0 = arith.constant 0 : i32
    return %arg0, %c0_i32, %arg2 : i32, i32, i32
  }
  func.func @transform_3(%arg0: i32, %arg1: i32, %arg2: i32) -> (i32, i32, i32) {
    %c0_i32 = arith.constant 0 : i32
    %c0_i32_0 = arith.constant 0 : i32
    return %arg0, %c0_i32, %arg2 : i32, i32, i32
  }
  func.func @transform_4(%arg0: i32, %arg1: i32, %arg2: i32) -> (i32, i32, i32) {
    %c0_i32 = arith.constant 0 : i32
    return %arg0, %arg1, %arg2 : i32, i32, i32
  }
}

</mosaic_0001>

<bundles_post_ra>
// kernel: tpu_custom_call.1
= control target key start
LH: loop header
LB: loop body
LE: loop exit
PB: predicated region body
PF: predicated region fallthrough
CT: control target
= control target key end

     0   :  { %9 = vsyncpa [#allocation3], 0  ;;  %s824_s0 = inlined_call_operand.vmem [shape: f32[2,8,4], index: 0, kind: input, shape index: {}]   ;;  %s825_s1 = inlined_call_operand.vmem [shape: f32[2,8,2], index: 1, kind: input, shape index: {}]   ;;  %s826_s2 = inlined_call_operand.vmem [shape: f32[2,4,128], index: 2, kind: input, shape index: {}]   ;;  %s827_s3 = inlined_call_operand.vmem [shape: f32[2,2,128], index: 3, kind: input, shape index: {}]   ;;  %s828_s4 = inlined_call_operand.hbm [shape: f32[2,8,128], index: 4, kind: output, shape index: {}]  }
   0x1   :  { %11 = vsyncpa [#allocation3 + $0x1], 0  ;;  %s711_s15 = smov 0   ;;  %s713_s16 = smov 0  }
   0x2   :  { %s715_s17 = smov 0   ;;  %s717_s18 = smov 0  }
   0x3   :  { %s719_s19 = smov 0   ;;  %s721_s20 = smov 0  }
   0x4 LB: > { %s522_s21 = sadd.s32 4294967295, %s679_s20   ;;  %s523_s22 = sadd.s32 4294967294, %s679_s20   ;;  %s679_s20 = sphi %s721_s20, %s17_s20   ;;  %s675_s19 = sphi %s719_s19, %s835_s19   ;;  %s671_s18 = sphi %s717_s18, %s834_s18   ;;  %s667_s17 = sphi %s715_s17, %s833_s17   ;;  %s663_s16 = sphi %s713_s16, %s832_s16   ;;  %s659_s15 = sphi %s711_s15, %s831_s15  }
   0x5   : > { %s36_s23 = sadd.s32 1, %s675_s19  ;;  %s159_s24 = sadd.s32 1, %s667_s17 }
   0x6   : > { %p38_p0 = scmp.ge.s32.totalorder %s36_s23, 2  ;;  %p169_p1 = scmp.ne.s32.totalorder %s667_s17, %s663_s16 }
   0x7   : > { %p170_p2 = scmp.eq.s32.totalorder %s522_s21, 1  ;;  %p175_p3 = scmp.ne.s32.totalorder %s663_s16, %s659_s15 }
   0x8   : > { %s837_s23 = smov (%p38_p0, %s36_s23), 0  ;;  %p176_p5 = scmp.eq.s32.totalorder %s523_s22, 1 }
   0x9   : > { %p751_p4 = por %p170_p2, %p169_p1  ;;  %s152_s26 = ssub.s32 %s675_s19, %s837_s23 }
   0xa   : > { %p526_p6 = scmp.ge.s32.totalorder %s679_s20, 1  ;;  %p157_p7 = scmp.eq.s32.totalorder %s152_s26, 0 }
   0xb   : > { %p758_p8 = por %p176_p5, %p175_p3  ;;  %p234_p9 = scmp.lt.s32.totalorder %s679_s20, 3 }
   0xc   : > { %s764_s28 = scalar_select %p157_p7, %s667_s17, %s159_s24  }
   0xd   : > { %p235_p10 = pnand %p526_p6, %p234_p9 }
   0xe   : > { %p283_p11 = scmp.lt.s32.totalorder (!%p235_p10), %s671_s18, 1  ;;  %s533_s5 = sshll.u32 (!%p235_p10), %s671_s18, 7 }
   0xf   : > { %238 = sbr.rel (%p235_p10) target bundleno = 199 (0xc7), region = 36  ;;  %s685_s13 = smov (!%p235_p10), [#allocation2]  }
  0x14   : > { %v681_v0 = vmov 0   ;;  %s768_s29 = scalar_select %p283_p11, %s671_s18, 1  ;;  %v682_v3 = vmov 1   ;;  %v683_v4 = vmov 2   ;;  %v684_v5 = vmov 3  }
  0x15   : > { %595 = vset.pattern.permute.xlu0 %v681_v0  ;;  %597 = vset.pattern.permute.xlu1 %v681_v0  ;;  %v318_v6 = vlaneseq }
  0x16   : > { %s528_s30 = sshll.u32 %s768_s29, 3  ;;  %s531_s11 = sshll.u32 %s768_s29, 1 }
  0x17   : > { %s296_s7 = scalar_lea.vmem %s825_s1, %s528_s30  ;;  %s289_s10 = scalar_lea.vmem %s824_s0, %s528_s30  ;;  %v319_v7 = vshrl.u32 %v318_v6, 7 }
  0x18   : > { %v311_v1 = vld [vmem:[%s296_s7] sm:$0xff]  ;;  %s310_s14 = scalar_lea.vmem %s827_s3, %s531_s11  ;;  %s530_s21 = sshll.u32 %s768_s29, 2 }
  0x19   : > { %v342_v2 = vld [vmem:[%s289_s10] sm:$0xff]  ;;  %315 = vperm.xlu0 %595, %v311_v1   ;;  %v320_v8 = vsub.s32 0, %v319_v7  ;;  %v329_v10 = vsub.s32 1, %v319_v7  ;;  %s303_s26 = scalar_lea.vmem %s826_s2, %s530_s21  ;;  %v371_v23 = vsub.s32 2, %v319_v7  ;;  %v381_v25 = vsub.s32 3, %v319_v7  ;;  %s280_s30 = sand.u32 1, %s663_s16  }
  0x1a   : > { %346 = vperm.xlu1 %597, %v342_v2   ;;  %v312_v9 = vld [vmem:[%s310_s14] sm:$0x3]  ;;  %s527_s29 = sshll.u32 %s280_s30, 3  ;;  %s400_s10 = scalar_lea.hbm %s828_s4, %s533_s5 }
  0x1b   : > { %v321_v11 = vrot.slane %v312_v9, %v320_v8  ;;  %v330_v13 = vrot.slane %v312_v9, %v329_v10  ;;  %v343_v21 = vld [vmem:[%s303_s26] sm:$0xf]  ;;  %s282_s6 = scalar_lea.vmem [#allocation2], %s527_s29  ;;  %s387_s11 = scalar_lea.sflag [#allocation3], %s280_s30 }
  0x1c   : > { %v352_v24 = vrot.slane %v343_v21, %v320_v8  ;;  %v362_v28 = vrot.slane %v343_v21, %v329_v10  ;;  %v372_v29 = vrot.slane %v343_v21, %v371_v23  ;;  %v382_v34 = vrot.slane %v343_v21, %v381_v25  ;;  %s402_s7 = sshll.u32 %s282_s6, 4  ;;  %s607_s14 = sshll.u32 %s685_s13, 4  ;;  %s403_s7 = int_to_ptr.vmem [resolvable:$true] %s402_s7  ;;  %s608_s14 = int_to_ptr.vmem [resolvable:$false] %s607_s14 }
  0x1d   : > { %596 = vset.pattern.permute.xlu0 %v682_v3  ;;  %s603_s12 = scalar_lea.vmem %s403_s7, 128  ;;  %s609_s18 = scalar_lea.vmem %s608_s14, 256 }
  0x1e   : > { %598 = vset.pattern.permute.xlu1 %v682_v3  ;;  %324 = vperm.xlu0 %596, %v311_v1   ;;  %p604_p12 = scmp.ne.s32.totalorder %s403_s7, %s603_s12  ;;  %p610_p1 = scmp.lt.s32.totalorder %s403_s7, %s608_s14 }
  0x1f   : > { %356 = vperm.xlu1 %598, %v342_v2   ;;  %p611_p2 = scmp.lt.s32.totalorder %s609_s18, %s603_s12 }
  0x20   : > { %p605_p13 = pnand %p604_p12, %p751_p4 }
  0x21   : > { %p612_p3 = por %p611_p2, %p610_p1 }
  0x22   : > { %600 = vset.pattern.permute.xlu0 %v684_v5  ;;  %p606_p0 = pneg %p605_p13 }
  0x23   : > { %599 = vset.pattern.permute.xlu1 %v683_v4  ;;  %376 = vperm.xlu0 %600, %v342_v2  }
  0x24   : > { %366 = vperm.xlu1 %599, %v342_v2   ;;  %p613_p5 = pnand %p612_p3, %p606_p0 }
  0x94   : > { %v316_v12 = vpop.permute.xlu0 %315 }
  0x95   : > { %v322_v14 = vsub.f32 %v316_v12, %v321_v11  ;;  %v347_v20 = vpop.permute.xlu1 %346 }
  0x96   : > { %v353_v33 = vmul.f32 %v352_v24, %v347_v20 }
  0x97   : > { %v332_v17 = vmul.f32 %v322_v14, %v322_v14 }
  0x99   : > { %v325_v15 = vpop.permute.xlu0 %324 }
  0x9a   : > { %v331_v16 = vsub.f32 %v325_v15, %v330_v13  ;;  %v357_v22 = vpop.permute.xlu1 %356 }
  0x9b   : > { %v363_v38 = vmul.f32 %v362_v28, %v357_v22 }
  0x9c   : > { %v333_v18 = vmul.f32 %v331_v16, %v331_v16 }
  0x9e   : > { %v334_v19 = vadd.f32 %v333_v18, %v332_v17  ;;  %v377_v36 = vpop.permute.xlu0 %376 }
  0x9f   : > { %v367_v31 = vpop.permute.xlu1 %366  ;;  %v383_v41 = vmul.f32 %v382_v34, %v377_v36 }
  0xa0   : > { %601 = vrsqrt.f32 %v334_v19  ;;  %vm337_vm0 = vcmp.eq.f32.partialorder %v334_v19, inf  ;;  %v340_v30 = vand.u32 2147483648, %v334_v19  ;;  %vm339_vm1 = vcmp.eq.f32.partialorder %v334_v19, 0.0 }
  0xa1   : > { %v373_v39 = vmul.f32 %v372_v29, %v367_v31 }
  0xad   : > { %v602_v26 = vpop.eup %601 }
  0xae   : > { %v336_v27 = vmul.f32 %v602_v26, %v334_v19 }
  0xb0   : > { %v338_v32 = vsel %vm337_vm0, %v334_v19, %v336_v27 }
  0xb1   : > { %v341_v35 = vsel %vm339_vm1, %v340_v30, %v338_v32 }
  0xb2   : > { %v354_v37 = vadd.f32 %v353_v33, %v341_v35 }
  0xb4   : > { %v364_v40 = vadd.f32 %v363_v38, %v354_v37 }
  0xb6   : > { %v374_v42 = vadd.f32 %v373_v39, %v364_v40 }
  0xb8   : > { %v384_v43 = vadd.f32 %v383_v41, %v374_v42 }
  0xba   : > { %385 = vst [vmem:[%s282_s6] sm:$0xff] %v384_v43 }
  0xbb   : > { %616 = shalt.err (!%p613_p5)
}
  0xbc   : > { %s617_s21 = scalar_lea.hbm %s400_s10, 128  ;;  %s621_s26 = scalar_lea.hbm %s828_s4, 256 }
  0xbd   : > { %p618_p6 = scmp.ne.s32.totalorder %s400_s10, %s617_s21  ;;  %p622_p10 = scmp.lt.s32.totalorder %s400_s10, %s828_s4 }
  0xbe   : > { %p623_p11 = scmp.lt.s32.totalorder %s621_s26, %s617_s21 }
  0xbf   : > { %p619_p7 = pnand %p618_p6, %p751_p4 }
  0xc0   : > { %p624_p12 = por %p623_p11, %p622_p10 }
  0xc1   : > { %p620_p9 = pneg %p619_p7 }
  0xc3   : > { %p625_p13 = pnand %p624_p12, %p620_p9 }
  0xc5   : > { %628 = shalt.err (!%p625_p13)
}
  0xc6   : > { %536 = dma.vmem_to_hbm [thread:$0]  (%p751_p4), %s403_s7, 128, %s400_s10, %s387_s11  }
  0xc7 PF: > { %p542_p0 = scmp.ge.s32.totalorder %s679_s20, 2  ;;  %s414_s5 = sand.u32 1, %s659_s15  }
  0xc8   : > { %s415_s6 = scalar_lea.sflag [#allocation3], %s414_s5 }
  0xc9   : > { %p539_p1 = pnand %p542_p0, %p758_p8 }
  0xcb   : > { %p540_p2 = pneg %p539_p1 }
  0xcd   : > { %654 = dma.done.wait (%p540_p2), %s415_s6, 128  }
  0xce   : > { %656 = vsyncadd (%p540_p2), %s415_s6, 4294967168  ;;  %s17_s20 = sadd.s32 1, %s679_s20   ;;  %s831_s15 = smov %s663_s16 }
  0xcf   : > { %p14_p3 = scmp.ge.s32.totalorder %s17_s20, 4   ;;  %s832_s16 = smov %s667_s17 }
  0xd0   : > { %s833_s17 = smov %s764_s28  ;;  %s834_s18 = smov %s675_s19 }
  0xd1   : > { %s835_s19 = smov %s837_s23  ;;  %16 = sbr.rel (!%p14_p3) target bundleno = 4 (0x4), region = 80 }
  0xd6   :  { %420 = vsyncpa [#allocation3], 1 }
  0xd7   :  { %422 = vsyncpa [#allocation3 + $0x1], 1 }

</bundles_post_ra>
